<compile_context>
chip_gen: v7x
topology: tpu7x:2x2x1
jax: 0.10.0
libtpu: 0.0.40
codegen_flags: <defaults>
</compile_context>

<pallas_src>
import functools

import jax
import jax.numpy as jnp
import numpy as np
from jax.experimental import pallas as pl
from jax.experimental.pallas import tpu as pltpu


def dense_kernel(x_ref, w_ref, b_ref, o_ref, *, precision):
    """One (i, j, k) grid step: o(i,j) += x(i,k) @ w(k,j); bias fused at k==0."""
    k = pl.program_id(2)

    @pl.when(k == 0)
    def _():
        # Initialize the resident output tile with the broadcast bias row:
        # fuses the bias add into the zero-init for free.
        o_ref[...] = jnp.broadcast_to(b_ref[...], o_ref.shape)

    o_ref[...] += jnp.dot(
        x_ref[...],
        w_ref[...],
        preferred_element_type=jnp.float32,
        precision=precision,
    )


def _round_up(x, m):
    return ((x + m - 1) // m) * m


def dense_forward(x, w, b, *, tm=512, tn=512, tk=512, precision=None):
    """x: (M, K) f32, w: (K, N) f32, b: (N,) f32 -> (M, N) f32."""
    M, K = x.shape
    Kw, N = w.shape
    assert K == Kw, "input_dim mismatch"
    assert b.shape == (N,), "bias shape mismatch"

    # --- N axis: keep the output lane-dense.  Sub-128 output lanes lower to
    # masked vst.msk partial stores; pad N up to 128 with zero columns (the
    # result is sliced back after the call).
    Np = N if N >= 128 else 128

    # --- K axis (contraction) must be tiled exactly: a partial K block would
    # feed undefined data into the accumulation.  If K is larger than the
    # target tile and not divisible, zero-pad K instead of keeping K whole
    # (zeros contribute nothing to the sum; keeps the W tile bounded).
    if K <= tk:
        tk_ = K
        Kp = K
    else:
        tk_ = tk
        Kp = _round_up(K, tk_)

    # --- M / N tiles: full dim when small (always a legal block shape),
    # otherwise the (256-multiple) target; partial edge blocks are masked by
    # Pallas, which is safe on the non-contracting axes.
    tm_ = M if M <= tm else tm
    tn_ = Np if Np <= tn else tn

    # Zero padding is numerically inert for a matmul + bias.
    if Kp != K:
        x = jnp.pad(x, ((0, 0), (0, Kp - K)))
    if Kp != K or Np != N:
        w = jnp.pad(w, ((0, Kp - K), (0, Np - N)))
    if Np != N:
        b = jnp.pad(b, (0, Np - N))

    b2 = b.reshape(1, Np)  # 2D bias row for a clean lane-major layout

    m_blocks = pl.cdiv(M, tm_)
    n_blocks = pl.cdiv(Np, tn_)
    k_blocks = Kp // tk_
    grid = (m_blocks, n_blocks, k_blocks)

    # Only raise the scoped-VMEM limit if the requested tiles actually need it
    # (capped below v7x's 64 MiB physical VMEM).  Default 512 tiles fit in
    # every generation's default scoped limit, so this is a no-op there.
    compiler_kwargs = dict(
        dimension_semantics=("parallel", "parallel", "arbitrary"),
    )
    vmem_bytes = 4 * (2 * (tm_ * tk_ + tk_ * tn_) + 2 * tm_ * tn_ + 2 * tn_)
    if vmem_bytes > 12 * 1024 * 1024:
        compiler_kwargs["vmem_limit_bytes"] = min(
            int(vmem_bytes * 1.5), 60 * 1024 * 1024
        )

    # Truthful HBM traffic: x is re-streamed once per N block, W once per M
    # block, the output is written once, bias read once.
    cost = pl.CostEstimate(
        flops=2 * M * Kp * Np,
        transcendentals=0,
        bytes_accessed=4 * (M * Kp * n_blocks + Kp * Np * m_blocks + M * Np + Np),
    )

    out = pl.pallas_call(
        functools.partial(dense_kernel, precision=precision),
        out_shape=jax.ShapeDtypeStruct((M, Np), jnp.float32),
        grid_spec=pltpu.PrefetchScalarGridSpec(
            num_scalar_prefetch=0,
            grid=grid,
            in_specs=[
                pl.BlockSpec((tm_, tk_), lambda i, j, k: (i, k)),  # x tile
                pl.BlockSpec((tk_, tn_), lambda i, j, k: (k, j)),  # W tile
                pl.BlockSpec((1, tn_), lambda i, j, k: (0, j)),    # bias row
            ],
            out_specs=pl.BlockSpec((tm_, tn_), lambda i, j, k: (i, j)),
        ),
        compiler_params=pltpu.CompilerParams(**compiler_kwargs),
        cost_estimate=cost,
    )(x, w, b2)

    return out if Np == N else out[:, :N]


def glorot_weight(key, input_dim, output_dim):
    """Matches weight_variable_glorot: U(-r, r), r = sqrt(6/(in+out))."""
    init_range = np.sqrt(6.0 / (input_dim + output_dim))
    return jax.random.uniform(
        key, (input_dim, output_dim), dtype=jnp.float32,
        minval=-init_range, maxval=init_range,
    )


if __name__ == "__main__":
    input_dim = 32
    output_dim = 64
    M = 16  # number of rows (e.g. nodes / batch)

    key = jax.random.PRNGKey(0)
    kx, kw = jax.random.split(key)

    x = jax.random.normal(kx, (M, input_dim), dtype=jnp.float32)
    W = glorot_weight(kw, input_dim, output_dim)
    bias = jnp.zeros((output_dim,), dtype=jnp.float32)

    out = dense_forward(x, W, bias)
    out = jax.block_until_ready(out)

    # Correctness check against plain-JAX reference of the PyTorch forward.
    ref = x @ W + bias
    np.testing.assert_allclose(np.asarray(out), np.asarray(ref),
                               rtol=1e-5, atol=1e-5)

    print("KERNEL_OK")
</pallas_src>

<mosaic_0001>
module attributes {stable_mosaic.version = 11 : i64} {
  func.func @dense_kernel(%arg0: i32, %arg1: i32, %arg2: i32, %arg3: memref<16x32xf32, #tpu.memory_space<vmem>>, %arg4: memref<32x128xf32, #tpu.memory_space<vmem>>, %arg5: memref<1x128xf32, #tpu.memory_space<vmem>>, %arg6: memref<16x128xf32, #tpu.memory_space<vmem>>) attributes {dimension_semantics = [#tpu.dimension_semantics<parallel>, #tpu.dimension_semantics<parallel>, #tpu.dimension_semantics<arbitrary>], iteration_bounds = array<i64: 1, 1, 1>, scalar_prefetch = 0 : i64, scratch_operands = 0 : i64, tpu.core_type = #tpu.core_type<tc>, window_params = [{transform_indices = @transform_0, window_bounds = array<i64: 16, 32>}, {transform_indices = @transform_1, window_bounds = array<i64: 32, 128>}, {transform_indices = @transform_2, window_bounds = array<i64: 1, 128>}, {transform_indices = @transform_3, window_bounds = array<i64: 16, 128>}]} {
    %c0_i32 = arith.constant 0 : i32
    %0 = arith.cmpi eq, %arg2, %c0_i32 : i32
    %1 = arith.extui %0 : i1 to i32
    %c0_i32_0 = arith.constant 0 : i32
    %2 = arith.cmpi ne, %1, %c0_i32_0 : i32
    scf.if %2 {
      %c0_8 = arith.constant 0 : index
      %c0_9 = arith.constant 0 : index
      %9 = vector.load %arg5[%c0_8, %c0_9] : memref<1x128xf32, #tpu.memory_space<vmem>>, vector<1x128xf32>
      %10 = vector.shape_cast %9 : vector<1x128xf32> to vector<1x128xf32>
      %11 = vector.broadcast %10 : vector<1x128xf32> to vector<16x128xf32>
      %c0_10 = arith.constant 0 : index
      %c0_11 = arith.constant 0 : index
      %12 = vector.load %arg6[%c0_10, %c0_11] : memref<16x128xf32, #tpu.memory_space<vmem>>, vector<16x128xf32>
      tpu.vector_store %arg6[%c0_10, %c0_11], %11 {strides = array<i32>} : memref<16x128xf32, #tpu.memory_space<vmem>>, vector<16x128xf32>,
    } else {
    }
    %c0 = arith.constant 0 : index
    %c0_1 = arith.constant 0 : index
    %3 = vector.load %arg6[%c0, %c0_1] : memref<16x128xf32, #tpu.memory_space<vmem>>, vector<16x128xf32>
    %c0_2 = arith.constant 0 : index
    %c0_3 = arith.constant 0 : index
    %4 = vector.load %arg3[%c0_2, %c0_3] : memref<16x32xf32, #tpu.memory_space<vmem>>, vector<16x32xf32>
    %c0_4 = arith.constant 0 : index
    %c0_5 = arith.constant 0 : index
    %5 = vector.load %arg4[%c0_4, %c0_5] : memref<32x128xf32, #tpu.memory_space<vmem>>, vector<32x128xf32>
    %cst = arith.constant dense<0.000000e+00> : vector<16x128xf32>
    %6 = tpu.matmul %4, %5, %cst {dimension_numbers = #tpu.dot_dimension_numbers<[1], [0], [0], [1], [0, 0, 1, 1], [], []>} : vector<16x32xf32>, vector<32x128xf32>, vector<16x128xf32> -> vector<16x128xf32>
    %7 = arith.addf %3, %6 : vector<16x128xf32>
    %c0_6 = arith.constant 0 : index
    %c0_7 = arith.constant 0 : index
    %8 = vector.load %arg6[%c0_6, %c0_7] : memref<16x128xf32, #tpu.memory_space<vmem>>, vector<16x128xf32>
    tpu.vector_store %arg6[%c0_6, %c0_7], %7 {strides = array<i32>} : memref<16x128xf32, #tpu.memory_space<vmem>>, vector<16x128xf32>,
    return
  }
  func.func @transform_0(%arg0: i32, %arg1: i32, %arg2: i32) -> (i32, i32) {
    %c0_i32 = arith.constant 0 : i32
    return %arg0, %arg2 : i32, i32
  }
  func.func @transform_1(%arg0: i32, %arg1: i32, %arg2: i32) -> (i32, i32) {
    %c0_i32 = arith.constant 0 : i32
    return %arg2, %arg1 : i32, i32
  }
  func.func @transform_2(%arg0: i32, %arg1: i32, %arg2: i32) -> (i32, i32) {
    %c0_i32 = arith.constant 0 : i32
    %c0_i32_0 = arith.constant 0 : i32
    return %c0_i32, %arg1 : i32, i32
  }
  func.func @transform_3(%arg0: i32, %arg1: i32, %arg2: i32) -> (i32, i32) {
    %c0_i32 = arith.constant 0 : i32
    return %arg0, %arg1 : i32, i32
  }
}

</mosaic_0001>

<bundles_post_ra>
// kernel: tpu_custom_call.1
= control target key start
LH: loop header
LB: loop body
LE: loop exit
PB: predicated region body
PF: predicated region fallthrough
CT: control target
= control target key end

     0   :  { %8 = vsyncpa [#allocation3], 0  ;;  %s346_s0 = inlined_call_operand.hbm [shape: f32[16,32], index: 0, kind: input, shape index: {}]   ;;  %s347_s1 = inlined_call_operand.hbm [shape: f32[32,128], index: 1, kind: input, shape index: {}]   ;;  %s348_s2 = inlined_call_operand.vmem [shape: f32[1,128], index: 2, kind: input, shape index: {}]   ;;  %s349_s3 = inlined_call_operand.hbm [shape: f32[16,128], index: 3, kind: output, shape index: {}]  }
   0x1   :  { %9 = vsyncpa [#allocation6], 0 }
   0x2   :  { %10 = vsyncpa [#allocation4], 0  ;;  %s273_s12 = smov [#allocation2]   ;;  %s201_s16 = scalar_lea.hbm %s346_s0, 256 }
   0x3   :  { %s16_s13 = sshll.u32 %s273_s12, 4  ;;  %p202_p0 = scmp.ne.s32.totalorder %s346_s0, %s201_s16  ;;  %s17_s13 = int_to_ptr.vmem [resolvable:$true] %s16_s13 }
   0x4   :  { %p205_p1 = scmp.lt.u32.totalorder %s201_s16, %s346_s0 }
   0x6   :  { %p207_p2 = pnand %p205_p1, %p202_p0 }
   0x8   :  { %210 = shalt.err (!%p207_p2)
}
   0x9   :  { %s211_s21 = scalar_lea.vmem %s17_s13, 256  ;;  %p216_p4 = scmp.lt.s32.totalorder %s17_s13, %s17_s13 }
   0xa   :  { %p212_p3 = scmp.ne.s32.totalorder %s17_s13, %s211_s21  ;;  %p217_p5 = scmp.lt.s32.totalorder %s211_s21, %s211_s21 }
   0xc   :  { %p218_p6 = por %p217_p5, %p216_p4 }
   0xe   :  { %p219_p7 = pnand %p218_p6, %p212_p3 }
  0x10   :  { %222 = shalt.err (!%p219_p7)
}
  0x11   :  { %s274_s22 = smov 128   ;;  %s275_s23 = smov 8  }
  0x12   :  { %22 = dma.hbm_to_vmem [thread:$0]  %s346_s0, 256, %s17_s13, [#allocation3], %s274_s22, %s274_s22, %s275_s23  }
  0x13   :  { %s276_s26 = smov [#allocation5]   ;;  %s223_s30 = scalar_lea.hbm %s347_s1, 512 }
  0x14   :  { %s28_s27 = sshll.u32 %s276_s26, 4  ;;  %p224_p8 = scmp.ne.s32.totalorder %s347_s1, %s223_s30  ;;  %s29_s27 = int_to_ptr.vmem [resolvable:$true] %s28_s27 }
  0x15   :  { %p227_p9 = scmp.lt.u32.totalorder %s223_s30, %s347_s1 }
  0x17   :  { %p229_p10 = pnand %p227_p9, %p224_p8 }
  0x19   :  { %232 = shalt.err (!%p229_p10)
}
  0x1a   :  { %s233_s8 = scalar_lea.vmem %s29_s27, 512  ;;  %p238_p12 = scmp.lt.s32.totalorder %s29_s27, %s29_s27 }
  0x1b   :  { %p234_p11 = scmp.ne.s32.totalorder %s29_s27, %s233_s8  ;;  %p239_p13 = scmp.lt.s32.totalorder %s233_s8, %s233_s8 }
  0x1d   :  { %p240_p0 = por %p239_p13, %p238_p12 }
  0x1f   :  { %p241_p1 = pnand %p240_p0, %p234_p11 }
  0x21   :  { %244 = shalt.err (!%p241_p1)
}
  0x22   :  { %34 = dma.hbm_to_vmem [thread:$0]  %s347_s1, 512, %s29_s27, [#allocation6], %s274_s22, %s274_s22, %s275_s23  }
  0x23   :  { %267 = dma.done.wait [#allocation3], 256  }
  0x24   :  { %268 = vsyncadd [#allocation3], 4294967040 }
  0x25   :  { %269 = dma.done.wait [#allocation6], 512  }
  0x26   :  { %270 = vsyncadd [#allocation6], 4294966784  ;;  %vm64_vm0 = vcmask 261120   ;;  %v60_v0 = vld [vmem:[#allocation5] sm:$0xff]  ;;  %v61_v1 = vld [vmem:[#allocation5 + $0x8] sm:$0xff]  ;;  %s277_s11 = smov [#allocation7]  }
  0x27   :  { %v62_v2 = vld [vmem:[#allocation5 + $0x10] sm:$0xff]  ;;  %v188_v3 = vpack.c.bf16 %v61_v1, %v60_v0  ;;  %v63_v4 = vld [vmem:[#allocation5 + $0x18] sm:$0xff]  ;;  %s155_s12 = sshll.u32 %s277_s11, 4  ;;  %s156_s12 = int_to_ptr.vmem [resolvable:$true] %s155_s12 }
  0x28   :  { %v58_v5 = vld [vmem:[#allocation2] sm:$0xff]  ;;  %v192_v6 = vpack.c.bf16 %v63_v4, %v62_v2  ;;  %v59_v7 = vld [vmem:[#allocation2 + $0x8] sm:$0xff]  ;;  %s245_s13 = scalar_lea.vmem %s156_s12, 256  ;;  %p250_p3 = scmp.lt.s32.totalorder %s156_s12, %s156_s12 }
  0x29   :  { %185 = vmatprep.mubr.msk.f32.mxu0 %vm64_vm0, %v58_v5  ;;  %189 = vmatprep.subr.bf16.mxu0 %v188_v3  ;;  %v168_v8 = vld [vmem:[%s348_s2] ss:$0 sm:$0xff]  ;;  %p246_p2 = scmp.ne.s32.totalorder %s156_s12, %s245_s13  ;;  %p251_p4 = scmp.lt.s32.totalorder %s245_s13, %s245_s13 }
  0x2a   :  { %191 = vmatpush3.bf16.msra.mxu0 %v188_v3 }
  0x2b   :  { %193 = vmatprep.subr.bf16.mxu0 %v192_v6  ;;  %p252_p5 = por %p251_p4, %p250_p3 }
  0x2d   :  { %p253_p6 = pnand %p252_p5, %p246_p2 }
  0x2e   :  { %195 = vmatpush3.bf16.msra.mxu0 %v192_v6 }
  0x31   :  { %186 = vmatmul.mubr.msk.f32.vlgmr.msra.gmra.mrb[0].mxu0 %vm64_vm0, %v59_v7 }
 0x104   :  { %v187_v9 = vpop.f32.mrb[0].mxu0 }
 0x105   :  { %v147_v10 = vadd.f32 %v187_v9, %v168_v8  ;;  %v137_v11 = vpop.f32.mrb[1].mxu0 }
 0x106   :  { %v146_v12 = vadd.f32 %v168_v8, %v137_v11 }
 0x107   :  { %149 = vst [vmem:[#allocation7 + $0x8] sm:$0xff] %v147_v10 }
 0x108   :  { %148 = vst [vmem:[#allocation7] sm:$0xff] %v146_v12 }
 0x109   :  { %256 = shalt.err (!%p253_p6)
}
 0x10a   :  { %s257_s2 = scalar_lea.hbm %s349_s3, 256 }
 0x10b   :  { %p258_p7 = scmp.ne.s32.totalorder %s349_s3, %s257_s2  ;;  %p261_p8 = scmp.lt.u32.totalorder %s257_s2, %s349_s3 }
 0x10d   :  { %p263_p9 = pnand %p261_p8, %p258_p7 }
 0x10f   :  { %266 = shalt.err (!%p263_p9)
}
 0x110   :  { %161 = dma.vmem_to_hbm [thread:$0]  %s156_s12, 256, %s349_s3, [#allocation4], %s274_s22, %s274_s22, %s275_s23  }
 0x111   :  { %271 = dma.done.wait [#allocation4], 256  }
 0x112   :  { %272 = vsyncadd [#allocation4], 4294967040 }
 0x113   :  { %165 = vsyncpa [#allocation3], 1 }
 0x114   :  { %166 = vsyncpa [#allocation6], 1 }
 0x115   :  { %167 = vsyncpa [#allocation4], 1 }

</bundles_post_ra>
